<compile_context>
chip_gen: v6e
topology: v6e:2x2x1
jax: 0.10.0
libtpu: 0.0.40
codegen_flags: <defaults>
</compile_context>

<pallas_src>
import functools
import math

import jax
import jax.numpy as jnp
from jax.experimental import pallas as pl
from jax.experimental.pallas import tpu as pltpu


def _rp_kernel(lam_ref, a_ref, x_ref, o_ref, *, H, T, slope):
    """One grid step: all T projections for one channel and one lane tile.

    a_ref : (T*H, H)  the T projection matrices of this channel, row-stacked
    x_ref : (H, L)    this channel's pixels with N and W flattened into lanes
    o_ref : (H, L)    mean_t leaky_relu(lam*sqrt(H) * A[t] @ x)
    """
    scale = lam_ref[0]                                   # lambda * sqrt(H) (pre-folded)
    # Single (T*H, H) @ (H, L) MXU matmul covers all T projections at once.
    y = jnp.dot(a_ref[...], x_ref[...], preferred_element_type=jnp.float32)
    y = y * scale
    y = jnp.where(y >= 0, y, slope * y)                  # leaky_relu (f32 on the VPU)
    # Mean over the projection axis: sum T row-blocks of height H (T is static,
    # unrolled at trace time; H is a multiple of the 8-sublane tile here).
    acc = y[0:H, :]
    for t in range(1, T):
        acc = acc + y[t * H:(t + 1) * H, :]
    o_ref[...] = (acc * (1.0 / T)).astype(o_ref.dtype)


def _choose_lane_tile(nw, max_tile=2048):
    """Largest lane tile <= max_tile: full N*W if it fits, else a 128-multiple divisor."""
    if nw <= max_tile:
        return nw
    for l in range(max_tile, 127, -128):
        if nw % l == 0:
            return l
    return nw  # fallback: single block covering the whole lane axis


def cnn_random_projection(x, A, lambda_param, *, negative_slope=0.2, clamp=True,
                          operand_dtype=None):
    """Forward of CNNRandomProjection with defaults:
       resemble='partial', vector_based='column', leaky_relu, learnable lambda.

    x: (N, C, H, W), A: (T, C, H, H)  ->  (N, C, H, W)
    operand_dtype: optionally cast A/x to bf16 for the MXU (v6e/v7x); post-matmul
    math and accumulation stay float32.
    """
    N, C, H, W = x.shape
    T = A.shape[0]
    sqrt_d = math.sqrt(H)  # size == H for vector_based='column'

    # lambda_param.data.clamp_(0.2, 0.5) from the reference (learnable-lambda path);
    # fold sqrt(H) into the scalar so the kernel does a single multiply.
    lam = jnp.clip(lambda_param, 0.2, 0.5) if clamp else jnp.asarray(lambda_param)
    lam = (jnp.reshape(lam, (1,)) * sqrt_d).astype(jnp.float32)

    # Lane-dense layouts (XLA-side transposes, outside the kernel):
    #   x: (N,C,H,W) -> (C, H, N*W)    A: (T,C,H,H) -> (C, T*H, H)
    NW = N * W
    x_r = jnp.transpose(x, (1, 2, 0, 3)).reshape(C, H, NW)
    a_r = jnp.transpose(A, (1, 0, 2, 3)).reshape(C, T * H, H)
    if operand_dtype is not None:
        x_r = x_r.astype(operand_dtype)
        a_r = a_r.astype(operand_dtype)

    L = _choose_lane_tile(NW)
    n_lane_tiles = NW // L

    kernel = functools.partial(_rp_kernel, H=H, T=T, slope=negative_slope)

    out = pl.pallas_call(
        kernel,
        out_shape=jax.ShapeDtypeStruct((C, H, NW), x.dtype),
        grid=(C, n_lane_tiles),
        in_specs=[
            # lambda*sqrt(H) scalar lives in SMEM (full array, no tiling)
            pl.BlockSpec(memory_space=pltpu.MemorySpace.SMEM),
            # A tile for channel c: (T*H, H)
            pl.BlockSpec((pl.Squeezed(), T * H, H), lambda c, w: (c, 0, 0)),
            # x tile for channel c, lane tile w: (H, L)
            pl.BlockSpec((pl.Squeezed(), H, L), lambda c, w: (c, 0, w)),
        ],
        out_specs=pl.BlockSpec((pl.Squeezed(), H, L), lambda c, w: (c, 0, w)),
        compiler_params=pltpu.CompilerParams(
            dimension_semantics=("parallel", "parallel")),
    )(lam, a_r, x_r)

    # Back to NCHW: (C, H, N*W) -> (N, C, H, W)
    return jnp.transpose(out.reshape(C, H, N, W), (2, 0, 1, 3))


def _reference(x, A, lambda_param, negative_slope=0.2, clamp=True):
    """Pure-JAX re-implementation of the PyTorch forward for verification."""
    lam = jnp.clip(lambda_param, 0.2, 0.5) if clamp else lambda_param
    sqrt_d = math.sqrt(x.shape[2])
    x_new = jnp.einsum('tcih,nchw->ntciw', A, x)          # partial / column
    x_new = x_new * lam * sqrt_d
    x_new = jnp.where(x_new >= 0, x_new, negative_slope * x_new)
    return x_new.mean(axis=1)


if __name__ == "__main__":
    # Small shapes consistent with the module: x is (N, C, H, W).
    N, C, H, W = 2, 4, 16, 16
    T = 2  # num_projection

    key = jax.random.PRNGKey(0)
    kx, ka = jax.random.split(key)
    x = jax.random.normal(kx, (N, C, H, W), dtype=jnp.float32)
    # A ~ randn(num_projection, C, H, H) for resemble='partial', base='column'
    A = jax.random.normal(ka, (T, C, H, H), dtype=jnp.float32)
    # learnable lambda initialized to 0.3 (clamped to [0.2, 0.5] in forward)
    lambda_param = jnp.float32(0.3)

    out = cnn_random_projection(x, A, lambda_param, negative_slope=0.2, clamp=True)
    out = jax.block_until_ready(out)

    ref = _reference(x, A, lambda_param, negative_slope=0.2)
    assert out.shape == (N, C, H, W)
    assert jnp.allclose(out, ref, atol=1e-4, rtol=1e-4), "mismatch vs reference"

    print("KERNEL_OK")
</pallas_src>

<mosaic_0001>
module attributes {stable_mosaic.version = 11 : i64} {
  func.func @_rp_kernel(%arg0: i32, %arg1: i32, %arg2: memref<1xf32, #tpu.memory_space<smem>>, %arg3: memref<1x32x16xf32, #tpu.memory_space<vmem>>, %arg4: memref<1x16x32xf32, #tpu.memory_space<vmem>>, %arg5: memref<1x16x32xf32, #tpu.memory_space<vmem>>) attributes {dimension_semantics = [#tpu.dimension_semantics<parallel>, #tpu.dimension_semantics<parallel>], iteration_bounds = array<i64: 4, 1>, scalar_prefetch = 0 : i64, scratch_operands = 0 : i64, tpu.core_type = #tpu.core_type<tc>, window_params = [{transform_indices = @transform_0, window_bounds = array<i64: 1>}, {transform_indices = @transform_1, window_bounds = array<i64: 1, 32, 16>}, {transform_indices = @transform_2, window_bounds = array<i64: 1, 16, 32>}, {transform_indices = @transform_3, window_bounds = array<i64: 1, 16, 32>}]} {
    %c0 = arith.constant 0 : index
    %0 = memref.load %arg2[%c0] : memref<1xf32, #tpu.memory_space<smem>>
    %c0_0 = arith.constant 0 : index
    %c0_1 = arith.constant 0 : index
    %c0_2 = arith.constant 0 : index
    %1 = vector.load %arg3[%c0_0, %c0_1, %c0_2] : memref<1x32x16xf32, #tpu.memory_space<vmem>>, vector<1x32x16xf32>
    %2 = vector.shape_cast %1 : vector<1x32x16xf32> to vector<32x16xf32>
    %c0_3 = arith.constant 0 : index
    %c0_4 = arith.constant 0 : index
    %c0_5 = arith.constant 0 : index
    %3 = vector.load %arg4[%c0_3, %c0_4, %c0_5] : memref<1x16x32xf32, #tpu.memory_space<vmem>>, vector<1x16x32xf32>
    %4 = vector.shape_cast %3 : vector<1x16x32xf32> to vector<16x32xf32>
    %cst = arith.constant dense<0.000000e+00> : vector<32x32xf32>
    %5 = tpu.matmul %2, %4, %cst {dimension_numbers = #tpu.dot_dimension_numbers<[1], [0], [0], [1], [0, 0, 1, 1], [], []>} : vector<32x16xf32>, vector<16x32xf32>, vector<32x32xf32> -> vector<32x32xf32>
    %6 = vector.broadcast %0 : f32 to vector<32x32xf32>
    %7 = arith.mulf %5, %6 : vector<32x32xf32>
    %cst_6 = arith.constant 0.000000e+00 : f32
    %8 = vector.broadcast %cst_6 : f32 to vector<32x32xf32>
    %9 = arith.cmpf oge, %7, %8 : vector<32x32xf32>
    %cst_7 = arith.constant 2.000000e-01 : f32
    %10 = vector.broadcast %cst_7 : f32 to vector<32x32xf32>
    %11 = arith.mulf %10, %7 : vector<32x32xf32>
    %12 = arith.select %9, %7, %11 : vector<32x32xi1>, vector<32x32xf32>
    %13 = vector.extract_strided_slice %12 {offsets = [0, 0], sizes = [16, 32], strides = [1, 1]} : vector<32x32xf32> to vector<16x32xf32>
    %14 = vector.extract_strided_slice %12 {offsets = [16, 0], sizes = [16, 32], strides = [1, 1]} : vector<32x32xf32> to vector<16x32xf32>
    %15 = arith.addf %13, %14 : vector<16x32xf32>
    %cst_8 = arith.constant 5.000000e-01 : f32
    %16 = vector.broadcast %cst_8 : f32 to vector<16x32xf32>
    %17 = arith.mulf %15, %16 : vector<16x32xf32>
    %c0_9 = arith.constant 0 : index
    %c0_10 = arith.constant 0 : index
    %c0_11 = arith.constant 0 : index
    %18 = vector.load %arg5[%c0_9, %c0_10, %c0_11] : memref<1x16x32xf32, #tpu.memory_space<vmem>>, vector<1x16x32xf32>
    %19 = vector.shape_cast %18 : vector<1x16x32xf32> to vector<16x32xf32>
    %20 = vector.shape_cast %17 : vector<16x32xf32> to vector<1x16x32xf32>
    tpu.vector_store %arg5[%c0_9, %c0_10, %c0_11], %20 {strides = array<i32>} : memref<1x16x32xf32, #tpu.memory_space<vmem>>, vector<1x16x32xf32>,
    return
  }
  func.func @transform_0(%arg0: i32, %arg1: i32) -> i32 {
    %c0_i32 = arith.constant 0 : i32
    %c0_i32_0 = arith.constant 0 : i32
    return %c0_i32 : i32
  }
  func.func @transform_1(%arg0: i32, %arg1: i32) -> (i32, i32, i32) {
    %c0_i32 = arith.constant 0 : i32
    %c0_i32_0 = arith.constant 0 : i32
    %c0_i32_1 = arith.constant 0 : i32
    return %arg0, %c0_i32, %c0_i32_0 : i32, i32, i32
  }
  func.func @transform_2(%arg0: i32, %arg1: i32) -> (i32, i32, i32) {
    %c0_i32 = arith.constant 0 : i32
    %c0_i32_0 = arith.constant 0 : i32
    return %arg0, %c0_i32, %arg1 : i32, i32, i32
  }
  func.func @transform_3(%arg0: i32, %arg1: i32) -> (i32, i32, i32) {
    %c0_i32 = arith.constant 0 : i32
    %c0_i32_0 = arith.constant 0 : i32
    return %arg0, %c0_i32, %arg1 : i32, i32, i32
  }
}

</mosaic_0001>

<bundles_post_ra>
// kernel: tpu_custom_call.1
= control target key start
LH: loop header
LB: loop body
LE: loop exit
PB: predicated region body
PF: predicated region fallthrough
CT: control target
= control target key end

     0   :  { %s773_s0 = inlined_call_operand.<no memory space> [shape: f32[1], index: 0, kind: input, shape index: {}]   ;;  %s774_s1 = inlined_call_operand.vmem [shape: f32[4,32,16], index: 1, kind: input, shape index: {}]   ;;  %s775_s2 = inlined_call_operand.vmem [shape: f32[4,16,32], index: 2, kind: input, shape index: {}]   ;;  %s776_s3 = inlined_call_operand.hbm [shape: f32[4,16,32], index: 3, kind: output, shape index: {}]  }
   0x1   :  { %8 = sst [smem:[#allocation2]] %s773_s0 }
   0x2   :  { %9 = vsyncpa [#allocation4], 0 }
   0x3   :  { %11 = vsyncpa [#allocation4 + $0x1], 0  ;;  %s652_s14 = smov 0   ;;  %s654_s15 = smov 0  }
   0x4   :  { %s656_s16 = smov 0   ;;  %s658_s17 = smov 0  }
   0x5   :  { %s660_s18 = smov 0   ;;  %s662_s19 = smov 0  }
   0x6 LB: > { %s449_s0 = sadd.s32 4294967295, %s624_s19   ;;  %s450_s20 = sadd.s32 4294967294, %s624_s19   ;;  %s624_s19 = sphi %s662_s19, %s17_s19   ;;  %s620_s18 = sphi %s660_s18, %s783_s18   ;;  %s616_s17 = sphi %s658_s17, %s782_s17   ;;  %s612_s16 = sphi %s656_s16, %s781_s16   ;;  %s608_s15 = sphi %s654_s15, %s780_s15   ;;  %s604_s14 = sphi %s652_s14, %s779_s14  }
   0x7   : > { %s29_s21 = sadd.s32 1, %s620_s18  ;;  %s113_s22 = sadd.s32 1, %s612_s16 }
   0x8   : > { %p31_p0 = scmp.ge.s32.totalorder %s29_s21, 4  ;;  %p123_p1 = scmp.ne.s32.totalorder %s612_s16, %s608_s15 }
   0x9   : > { %p124_p2 = scmp.eq.s32.totalorder %s449_s0, 3  ;;  %p129_p3 = scmp.ne.s32.totalorder %s608_s15, %s604_s14 }
   0xa   : > { %s785_s21 = smov (%p31_p0, %s29_s21), 0  ;;  %p130_p5 = scmp.eq.s32.totalorder %s450_s20, 3 }
   0xb   : > { %p692_p4 = por %p124_p2, %p123_p1  ;;  %s108_s24 = ssub.s32 %s620_s18, %s785_s21 }
   0xc   : > { %p453_p6 = scmp.ge.s32.totalorder %s624_s19, 1  ;;  %p111_p7 = scmp.eq.s32.totalorder %s108_s24, 0 }
   0xd   : > { %p699_p8 = por %p130_p5, %p129_p3  ;;  %p170_p9 = scmp.lt.s32.totalorder %s624_s19, 5 }
   0xe   : > { %s705_s26 = scalar_select %p111_p7, %s612_s16, %s113_s22  }
   0xf   : > { %p171_p10 = pnand %p453_p6, %p170_p9 }
  0x10   : > { %p202_p11 = scmp.lt.s32.totalorder (!%p171_p10), %s616_s17, 3  ;;  %s215_s9 = sld [smem:[#allocation2]] (!%p171_p10) }
  0x11   : > { %174 = sbr.rel (%p171_p10) target bundleno = 252 (0xfc), region = 32  ;;  %s199_s10 = sand.u32 (!%p171_p10), 1, %s608_s15  }
  0x12   : > { %s454_s11 = sshll.u32 (!%p171_p10), %s199_s10, 4  ;;  %s470_s12 = sshll.u32 (!%p171_p10), %s616_s17, 8 }
  0x13   : > { %s201_s13 = scalar_lea.vmem (!%p171_p10), [#allocation3], %s454_s11  ;;  %s722_s24 = scalar_lea.hbm (!%p171_p10), %s776_s3, %s470_s12 }
  0x14   : > { %s359_s0 = sshll.u32 (!%p171_p10), %s201_s13, 4  ;;  %s724_s0 = int_to_ptr.vmem [resolvable:$true] %s359_s0 }
  0x16   : > { %s203_s27 = scalar_select %p202_p11, %s616_s17, 3  ;;  %vm222_vm0 = vcmask 130048   ;;  %v320_v6 = vstv %s215_s9  ;;  %vm341_vm5 = vcmask 261120  }
  0x17   : > { %s548_s17 = scalar_lea.vmem %s724_s0, 256 }
  0x18   : > { %s469_s28 = sshll.u32 %s203_s27, 4  ;;  %s468_s29 = sshll.u32 %s203_s27, 5 }
  0x19   : > { %s214_s5 = scalar_lea.vmem %s775_s2, %s469_s28  ;;  %s206_s8 = scalar_lea.vmem %s774_s1, %s468_s29 }
  0x1a   : > { %v221_v0 = vld [vmem:[%s214_s5 + $0x8] sm:$0xff]  ;;  %v220_v1 = vld [vmem:[%s214_s5] sm:$0xff]  ;;  %v218_v3 = vld [vmem:[%s206_s8 + $0x10] sm:$0xff]  ;;  %s728_s27 = scalar_lea.sflag [#allocation4], %s199_s10  ;;  %p549_p12 = scmp.ne.s32.totalorder %s724_s0, %s548_s17 }
  0x1b   : > { %477 = vmatprep.subr.mxu0 %v221_v0  ;;  %487 = vmatprep.subr.mxu1 %v221_v0  ;;  %v216_v2 = vld [vmem:[%s206_s8] sm:$0xff]  ;;  %v217_v4 = vld [vmem:[%s206_s8 + $0x8] sm:$0xff]  ;;  %v219_v5 = vld [vmem:[%s206_s8 + $0x18] sm:$0xff]  ;;  %s626_s28 = smov [#allocation3]  }
  0x1c   : > { %478 = vmatpush3.msra.mxu0 %v221_v0  ;;  %489 = vmatpush3.msra.mxu1 %v221_v0  ;;  %p550_p13 = pnand %p549_p12, %p692_p4  ;;  %s552_s29 = sshll.u32 %s626_s28, 4  ;;  %s553_s29 = int_to_ptr.vmem [resolvable:$false] %s552_s29 }
  0x1d   : > { %479 = vmatprep.subr.mxu0 %v220_v1  ;;  %488 = vmatprep.subr.mxu1 %v220_v1  ;;  %s554_s30 = scalar_lea.vmem %s553_s29, 512  ;;  %p555_p1 = scmp.lt.s32.totalorder %s724_s0, %s553_s29 }
  0x1e   : > { %480 = vmatpush3.msra.mxu0 %v220_v1  ;;  %490 = vmatpush3.msra.mxu1 %v220_v1  ;;  %p551_p0 = pneg %p550_p13  ;;  %p556_p2 = scmp.lt.s32.totalorder %s554_s30, %s548_s17 }
  0x1f   : > { %481 = vmatprep.mubr.msk.f32.mxu0 %vm222_vm0, %v216_v2  ;;  %484 = vmatprep.mubr.msk.f32.mxu1 %vm222_vm0, %v218_v3 }
  0x20   : > { %482 = vmatmul.mubr.msk.f32.vlgmr.msra.gmra.mxu0 %vm222_vm0, %v217_v4  ;;  %485 = vmatmul.mubr.msk.f32.vlgmr.msra.gmra.mxu1 %vm222_vm0, %v219_v5  ;;  %p557_p3 = por %p556_p2, %p555_p1 }
  0x22   : > { %p558_p5 = pnand %p557_p3, %p551_p0 }
  0xe0   : > { %v483_v7 = vpop.f32.mrf.mxu0  ;;  %v486_v8 = vpop.f32.mrf.mxu1 }
  0xe1   : > { %v322_v9 = vmul.f32 %v483_v7, %v320_v6  ;;  %v324_v10 = vmul.f32 %v486_v8, %v320_v6 }
  0xe2   : > { %v301_v11 = vpop.f32.mrf.mxu0  ;;  %v311_v12 = vpop.f32.mrf.mxu1 }
  0xe3   : > { %vm326_vm1 = vcmp.ge.f32.partialorder %v322_v9, 0.0  ;;  %v330_v13 = vmul.f32 0.2, %v322_v9  ;;  %vm328_vm2 = vcmp.ge.f32.partialorder %v324_v10, 0.0  ;;  %v332_v14 = vmul.f32 0.2, %v324_v10 }
  0xe4   : > { %v321_v15 = vmul.f32 %v320_v6, %v301_v11  ;;  %v323_v16 = vmul.f32 %v320_v6, %v311_v12 }
  0xe5   : > { %v334_v17 = vsel %vm326_vm1, %v322_v9, %v330_v13  ;;  %v336_v18 = vsel %vm328_vm2, %v324_v10, %v332_v14 }
  0xe6   : > { %v338_v19 = vadd.f32 %v336_v18, %v334_v17  ;;  %vm325_vm3 = vcmp.ge.f32.partialorder %v321_v15, 0.0  ;;  %v329_v20 = vmul.f32 0.2, %v321_v15  ;;  %vm327_vm4 = vcmp.ge.f32.partialorder %v323_v16, 0.0 }
  0xe7   : > { %v331_v21 = vmul.f32 0.2, %v323_v16 }
  0xe8   : > { %v340_v22 = vmul.f32 0.5, %v338_v19  ;;  %v333_v23 = vsel %vm325_vm3, %v321_v15, %v329_v20 }
  0xe9   : > { %v335_v24 = vsel %vm327_vm4, %v323_v16, %v331_v21 }
  0xea   : > { %343 = vst.msk [vmem:[%s201_s13 + $0x8] sm:$0xff] %vm341_vm5, %v340_v22  ;;  %v337_v25 = vadd.f32 %v335_v24, %v333_v23 }
  0xec   : > { %v339_v26 = vmul.f32 0.5, %v337_v25 }
  0xee   : > { %342 = vst.msk [vmem:[%s201_s13] sm:$0xff] %vm341_vm5, %v339_v26 }
  0xef   : > { %561 = shalt.err (!%p558_p5)
}
  0xf0   : > { %s562_s4 = scalar_lea.hbm %s722_s24, 256  ;;  %s566_s7 = scalar_lea.hbm %s776_s3, 1024 }
  0xf1   : > { %p563_p6 = scmp.ne.s32.totalorder %s722_s24, %s562_s4  ;;  %p567_p10 = scmp.lt.s32.totalorder %s722_s24, %s776_s3 }
  0xf2   : > { %p568_p11 = scmp.lt.s32.totalorder %s566_s7, %s562_s4 }
  0xf3   : > { %p564_p7 = pnand %p563_p6, %p692_p4 }
  0xf4   : > { %p569_p12 = por %p568_p11, %p567_p10 }
  0xf5   : > { %p565_p9 = pneg %p564_p7 }
  0xf7   : > { %p570_p13 = pnand %p569_p12, %p565_p9 }
  0xf9   : > { %573 = shalt.err (!%p570_p13)
}
  0xfa   : > { %s627_s10 = smov 128   ;;  %s628_s11 = smov 8  }
  0xfb   : > { %491 = dma.vmem_to_hbm [thread:$0]  (%p692_p4), %s724_s0, 256, %s722_s24, %s728_s27, %s627_s10, %s627_s10, %s628_s11  }
  0xfc PF: > { %p497_p0 = scmp.ge.s32.totalorder %s624_s19, 2  ;;  %s374_s12 = sand.u32 1, %s604_s14  }
  0xfd   : > { %s375_s13 = scalar_lea.sflag [#allocation4], %s374_s12 }
  0xfe   : > { %p494_p1 = pnand %p497_p0, %p699_p8 }
 0x100   : > { %p495_p2 = pneg %p494_p1 }
 0x102   : > { %599 = dma.done.wait (%p495_p2), %s375_s13, 256  }
 0x103   : > { %601 = vsyncadd (%p495_p2), %s375_s13, 4294967040  ;;  %s17_s19 = sadd.s32 1, %s624_s19   ;;  %s779_s14 = smov %s608_s15 }
 0x104   : > { %p14_p3 = scmp.ge.s32.totalorder %s17_s19, 6   ;;  %s780_s15 = smov %s612_s16 }
 0x105   : > { %s781_s16 = smov %s705_s26  ;;  %s782_s17 = smov %s620_s18 }
 0x106   : > { %s783_s18 = smov %s785_s21  ;;  %16 = sbr.rel (!%p14_p3) target bundleno = 6 (0x6), region = 70 }
 0x10b   :  { %380 = vsyncpa [#allocation4], 1 }
 0x10c   :  { %382 = vsyncpa [#allocation4 + $0x1], 1 }

</bundles_post_ra>
